<compile_context>
chip_gen: v7x
topology: tpu7x:2x2x1
jax: 0.10.0
libtpu: 0.0.40
codegen_flags: <defaults>
</compile_context>

<pallas_src>
import functools
import math

import jax
import jax.numpy as jnp
from jax.experimental import pallas as pl
from jax.experimental.pallas import tpu as pltpu

# Module hyperparameters (from __init__ defaults).
GAMMA_NEG = 4.0
GAMMA_POS = 1.0
CLIP = 0.05
EPS = 1e-8

_MIB = 1024 * 1024

# TODO(synk): disable_torch_grad_focal_loss only affects autograd (stop-gradient
# on the focal weight); it has no effect on this forward-only kernel.


def _pow_static(base, exponent):
    """base**exponent for a static Python exponent.

    Small integer exponents use repeated VPU multiplies (no EUP transcendentals);
    anything else falls back to jnp.power.
    """
    e_f = float(exponent)
    if e_f == int(e_f) and 0 <= int(e_f) <= 16:
        e = int(e_f)
        if e == 0:
            return jnp.ones_like(base)
        result = None
        acc = base
        while e:
            if e & 1:
                result = acc if result is None else result * acc
            e >>= 1
            if e:
                acc = acc * acc
        return result
    return jnp.power(base, exponent)


def _asl_kernel(x_ref, y_ref, out_ref, *, gamma_neg, gamma_pos, clip, eps,
                binary_targets, approx_recip):
    x = x_ref[...].astype(jnp.float32)
    y = y_ref[...].astype(jnp.float32)

    if binary_targets:
        # Exact for y in {0, 1}.
        is_pos = y > 0.5
        # One exp per element: t = exp(-x); sigmoid(x) = 1/(1+t);
        # log(sigmoid(x)) = -log(1+t) (no reciprocal needed on that path).
        t = jnp.exp(-x)
        one_plus_t = 1.0 + t
        xs_pos = pl.reciprocal(one_plus_t, approx=approx_recip)   # sigmoid(x)
        one_minus_xs_pos = 1.0 - xs_pos
        xs_neg = one_minus_xs_pos
        if clip is not None and clip > 0:
            xs_neg = jnp.minimum(xs_neg + clip, 1.0)
        # log(max(p, eps)) == max(log(p), log(eps)) (log monotonic), so the two
        # branch logs fuse into a single EUP log via a select.
        log_eps = math.log(eps)
        log_arg = jnp.where(is_pos, one_plus_t, xs_neg)
        sgn = jnp.where(is_pos, -1.0, 1.0)
        loss = jnp.maximum(sgn * jnp.log(log_arg), log_eps)
        if gamma_neg > 0 or gamma_pos > 0:
            w_pos = _pow_static(one_minus_xs_pos, gamma_pos)   # (1 - xs_pos)^gp
            w_neg = _pow_static(1.0 - xs_neg, gamma_neg)       # (1 - xs_neg)^gn
            loss = loss * jnp.where(is_pos, w_pos, w_neg)
    else:
        # General (soft-target) form, mirrors the PyTorch module verbatim.
        targets = y
        anti_targets = 1.0 - y
        xs_pos = jax.nn.sigmoid(x)
        xs_neg = 1.0 - xs_pos
        if clip is not None and clip > 0:
            xs_neg = jnp.minimum(xs_neg + clip, 1.0)
        loss = targets * jnp.log(jnp.maximum(xs_pos, eps))
        loss = loss + anti_targets * jnp.log(jnp.maximum(xs_neg, eps))
        if gamma_neg > 0 or gamma_pos > 0:
            xs_pos_t = xs_pos * targets
            xs_neg_t = xs_neg * anti_targets
            w = jnp.power(1.0 - xs_pos_t - xs_neg_t,
                          gamma_pos * targets + gamma_neg * anti_targets)
            loss = loss * w

    # Lane-dense partial: reduce only the batch (sublane) axis.  The final
    # cross-lane sum + negate happen once in the JAX wrapper.
    out_ref[...] = jnp.sum(loss, axis=0, keepdims=True)[None]


def _vmem_budget():
    """Generation-aware (per_step_input_bytes, vmem_limit_bytes, multi_core)."""
    vmem_bytes = None
    try:
        vmem_bytes = int(pltpu.get_tpu_info().vmem_capacity_bytes)
    except Exception:
        vmem_bytes = None
    if vmem_bytes is None or vmem_bytes <= 64 * _MIB:
        # v7x-like: 64 MiB VMEM per TensorCore, 2 TensorCores per chip.
        # (Also the conservative fallback if the hardware query fails.)
        return 20 * _MIB, 48 * _MIB, True
    # v5e / v6e: 128 MiB physical VMEM, single TensorCore.
    return 28 * _MIB, 64 * _MIB, False


def _sublane_multiple(itemsize):
    # Second-to-last block dim must be a multiple of this (or the full dim).
    return {4: 8, 2: 16, 1: 32}.get(int(itemsize), 8)


def _choose_tiles(B, C, *, x_itemsize, y_itemsize, per_step_input_bytes,
                  prefer_multi_step):
    """Pick (tb, tc): widest legal class tile first, then the tallest legal
    batch tile that fills (but does not exceed) the double-buffered input
    budget.  Block legality: last dim multiple of 128 (or full C); batch dim a
    multiple of the dtype's sublane packing (or full B)."""
    bytes_per_elem = 2 * (x_itemsize + y_itemsize)   # 2-deep pipelining
    sub = max(_sublane_multiple(x_itemsize), _sublane_multiple(y_itemsize))

    def tb_ok(t):
        return t == B or (B % t == 0 and t % sub == 0)

    def tc_ok(t):
        return t == C or (C % t == 0 and t % 128 == 0)

    # All divisors of B that are legal batch tiles, tallest first (no cap: the
    # batch tile is allowed to grow until it fills the budget).
    divs = set()
    i = 1
    while i * i <= B:
        if B % i == 0:
            divs.add(i)
            divs.add(B // i)
        i += 1
    tb_opts = sorted((t for t in divs if tb_ok(t)), reverse=True)

    tc_opts = [C] + sorted(
        (t for t in (128 * k for k in (128, 64, 32, 16, 8, 4, 2, 1))
         if t < C and tc_ok(t)), reverse=True)

    tb, tc = tb_opts[-1], tc_opts[-1]
    found = False
    for tc_cand in tc_opts:
        for tb_cand in tb_opts:
            if bytes_per_elem * tb_cand * tc_cand <= per_step_input_bytes:
                tb, tc = tb_cand, tc_cand
                found = True
                break
        if found:
            break

    if prefer_multi_step and (B // tb) * (C // tc) < 2:
        # v7x megacore: the grid is sharded across 2 TensorCores along the
        # "parallel" axes; a 1x1 grid leaves one core idle.  Prefer splitting
        # the class axis (keeps outputs lane-dense), else the batch axis.
        if tc % 2 == 0 and tc_ok(tc // 2):
            tc //= 2
        elif tb % 2 == 0 and tb_ok(tb // 2):
            tb //= 2

    return tb, tc


def asymmetric_loss(x, y, *, gamma_neg=GAMMA_NEG, gamma_pos=GAMMA_POS,
                    clip=CLIP, eps=EPS, binary_targets=None,
                    approx_reciprocal=False, tb=None, tc=None):
    """Scalar asymmetric loss, matching AsymmetricLossOptimized.forward.

    x, y are (batch, num_classes) and are consumed in whatever dtype they
    arrive in (ship bf16 logits / bf16-or-int8 binarized targets from the
    producer to halve HBM traffic; compute is f32 inside the kernel).

    binary_targets:
      None  -> inferred: integer/bool targets take the exact binary fast path,
               float targets take the general soft-target path.
      True  -> caller asserts y is binarized {0,1} (float y is thresholded at
               0.5 — soft labels would give a wrong loss).
      False -> general soft-target path, verbatim PyTorch semantics.
    approx_reciprocal: use the EUP approximate reciprocal for sigmoid in the
      binary path (v7x-only micro-opt; slightly perturbs the focal weights).
    """
    B, C = x.shape
    assert y.shape == (B, C), (x.shape, y.shape)

    if y.dtype == jnp.bool_:
        y = y.astype(jnp.int8)   # bool blocks are awkward; 1B->1B, negligible.
    if binary_targets is None:
        binary_targets = bool(jnp.issubdtype(y.dtype, jnp.integer))

    x_itemsize = jnp.dtype(x.dtype).itemsize
    y_itemsize = jnp.dtype(y.dtype).itemsize

    per_step_budget, vmem_limit, multi_core = _vmem_budget()

    if tb is None or tc is None:
        auto_tb, auto_tc = _choose_tiles(
            B, C, x_itemsize=x_itemsize, y_itemsize=y_itemsize,
            per_step_input_bytes=per_step_budget,
            prefer_multi_step=multi_core)
        tb = tb if tb is not None else auto_tb
        tc = tc if tc is not None else auto_tc
    assert B % tb == 0 and C % tc == 0, "shapes must tile by (tb, tc)"

    nb, nc = B // tb, C // tc

    kernel = functools.partial(
        _asl_kernel, gamma_neg=gamma_neg, gamma_pos=gamma_pos, clip=clip,
        eps=eps, binary_targets=bool(binary_targets),
        approx_recip=bool(approx_reciprocal))

    # Advisory cost hint so XLA schedules the surrounding graph (producers and
    # the final cross-lane sum) sensibly around the custom call.
    cost = pl.CostEstimate(
        flops=10 * B * C,
        transcendentals=(2 if binary_targets else 3) * B * C,
        bytes_accessed=B * C * (x_itemsize + y_itemsize) + nb * C * 4)

    partials = pl.pallas_call(
        kernel,
        out_shape=jax.ShapeDtypeStruct((nb, 1, C), jnp.float32),
        grid_spec=pltpu.PrefetchScalarGridSpec(
            num_scalar_prefetch=0,
            grid=(nb, nc),
            in_specs=[
                pl.BlockSpec((tb, tc), lambda i, j: (i, j)),
                pl.BlockSpec((tb, tc), lambda i, j: (i, j)),
            ],
            # Default 2-deep pipelining on purpose: the kernel is HBM-bound and
            # deeper buffering would only eat VMEM better spent on larger tiles.
            out_specs=pl.BlockSpec((1, 1, tc), lambda i, j: (i, 0, j)),
        ),
        compiler_params=pltpu.CompilerParams(
            # No shared state across grid steps -> fully parallel (v7x megacore).
            dimension_semantics=("parallel", "parallel"),
            vmem_limit_bytes=vmem_limit,
        ),
        cost_estimate=cost,
    )(x, y)

    # Single cross-lane reduction + negate, once, outside the kernel.
    return -jnp.sum(partials)


def asymmetric_loss_ref(x, y, *, gamma_neg=GAMMA_NEG, gamma_pos=GAMMA_POS,
                        clip=CLIP, eps=EPS):
    """Pure-JAX reference mirroring the PyTorch forward."""
    x = x.astype(jnp.float32)
    y = y.astype(jnp.float32)
    targets = y
    anti_targets = 1.0 - y
    xs_pos = jax.nn.sigmoid(x)
    xs_neg = 1.0 - xs_pos
    if clip is not None and clip > 0:
        xs_neg = jnp.minimum(xs_neg + clip, 1.0)
    loss = targets * jnp.log(jnp.maximum(xs_pos, eps))
    loss = loss + anti_targets * jnp.log(jnp.maximum(xs_neg, eps))
    if gamma_neg > 0 or gamma_pos > 0:
        xs_pos_t = xs_pos * targets
        xs_neg_t = xs_neg * anti_targets
        w = jnp.power(1.0 - xs_pos_t - xs_neg_t,
                      gamma_pos * targets + gamma_neg * anti_targets)
        loss = loss * w
    return -jnp.sum(loss)


if __name__ == "__main__":
    key = jax.random.PRNGKey(0)
    kx, ky, kx2, ky2, ks, kx3, ky3 = jax.random.split(key, 7)

    # --- Test 1: binarized f32 targets, f32 logits, auto tiles (also exercises
    #     the v7x 1x1-grid split when running on a multi-core part). ---
    B, C = 16, 256
    x = jax.random.normal(kx, (B, C), dtype=jnp.float32) * 2.0
    y = (jax.random.uniform(ky, (B, C)) < 0.3).astype(jnp.float32)
    loss = jax.block_until_ready(asymmetric_loss(x, y, binary_targets=True))
    ref = asymmetric_loss_ref(x, y)
    assert jnp.allclose(loss, ref, rtol=2e-5, atol=1e-2), (loss, ref)

    # --- Test 2: explicit multi-tile grid (exercises partial-sum outputs). ---
    B2, C2 = 32, 512
    x2 = jax.random.normal(kx2, (B2, C2), dtype=jnp.float32) * 2.0
    y2 = (jax.random.uniform(ky2, (B2, C2)) < 0.3).astype(jnp.float32)
    loss2 = jax.block_until_ready(
        asymmetric_loss(x2, y2, binary_targets=True, tb=16, tc=128))
    ref2 = asymmetric_loss_ref(x2, y2)
    assert jnp.allclose(loss2, ref2, rtol=2e-5, atol=1e-2), (loss2, ref2)

    # --- Test 3: narrow dtypes shipped by the caller (bf16 logits + int8
    #     binarized targets; binary path inferred from the integer dtype). ---
    x3 = (jax.random.normal(kx3, (B2, C2), dtype=jnp.float32) * 2.0
          ).astype(jnp.bfloat16)
    y3 = (jax.random.uniform(ky3, (B2, C2)) < 0.3).astype(jnp.int8)
    loss3 = jax.block_until_ready(asymmetric_loss(x3, y3))
    ref3 = asymmetric_loss_ref(x3.astype(jnp.float32), y3.astype(jnp.float32))
    assert jnp.allclose(loss3, ref3, rtol=2e-5, atol=5e-2), (loss3, ref3)

    # --- Test 4: soft float targets -> general path inferred automatically. ---
    y_soft = jax.random.uniform(ks, (B, C), dtype=jnp.float32)
    loss4 = jax.block_until_ready(asymmetric_loss(x, y_soft))
    ref4 = asymmetric_loss_ref(x, y_soft)
    assert jnp.allclose(loss4, ref4, rtol=2e-5, atol=1e-2), (loss4, ref4)

    print("KERNEL_OK")
</pallas_src>

<mosaic_0001>
module attributes {stable_mosaic.version = 11 : i64} {
  func.func @_asl_kernel(%arg0: i32, %arg1: i32, %arg2: memref<16x128xf32, #tpu.memory_space<vmem>>, %arg3: memref<16x128xf32, #tpu.memory_space<vmem>>, %arg4: memref<1x1x128xf32, #tpu.memory_space<vmem>>) attributes {dimension_semantics = [#tpu.dimension_semantics<parallel>, #tpu.dimension_semantics<parallel>], iteration_bounds = array<i64: 1, 2>, scalar_prefetch = 0 : i64, scratch_operands = 0 : i64, tpu.core_type = #tpu.core_type<tc>, window_params = [{transform_indices = @transform_0, window_bounds = array<i64: 16, 128>}, {transform_indices = @transform_1, window_bounds = array<i64: 16, 128>}, {transform_indices = @transform_2, window_bounds = array<i64: 1, 1, 128>}]} {
    %c0 = arith.constant 0 : index
    %c0_0 = arith.constant 0 : index
    %0 = vector.load %arg2[%c0, %c0_0] : memref<16x128xf32, #tpu.memory_space<vmem>>, vector<16x128xf32>
    %c0_1 = arith.constant 0 : index
    %c0_2 = arith.constant 0 : index
    %1 = vector.load %arg3[%c0_1, %c0_2] : memref<16x128xf32, #tpu.memory_space<vmem>>, vector<16x128xf32>
    %cst = arith.constant 5.000000e-01 : f32
    %2 = vector.broadcast %cst : f32 to vector<16x128xf32>
    %3 = arith.cmpf ogt, %1, %2 : vector<16x128xf32>
    %cst_3 = arith.constant 0.000000e+00 : f32
    %4 = vector.broadcast %cst_3 : f32 to vector<16x128xf32>
    %5 = arith.subf %4, %0 : vector<16x128xf32>
    %6 = math.exp %5 : vector<16x128xf32>
    %cst_4 = arith.constant 1.000000e+00 : f32
    %7 = vector.broadcast %cst_4 : f32 to vector<16x128xf32>
    %8 = arith.addf %7, %6 : vector<16x128xf32>
    %9 = tpu.reciprocal %8 : vector<16x128xf32> -> vector<16x128xf32>
    %cst_5 = arith.constant 1.000000e+00 : f32
    %10 = vector.broadcast %cst_5 : f32 to vector<16x128xf32>
    %11 = arith.subf %10, %9 : vector<16x128xf32>
    %cst_6 = arith.constant 5.000000e-02 : f32
    %12 = vector.broadcast %cst_6 : f32 to vector<16x128xf32>
    %13 = arith.addf %11, %12 : vector<16x128xf32>
    %cst_7 = arith.constant 1.000000e+00 : f32
    %14 = vector.broadcast %cst_7 : f32 to vector<16x128xf32>
    %15 = arith.minimumf %13, %14 : vector<16x128xf32>
    %16 = arith.select %3, %8, %15 : vector<16x128xi1>, vector<16x128xf32>
    %cst_8 = arith.constant -1.000000e+00 : f32
    %cst_9 = arith.constant 1.000000e+00 : f32
    %17 = vector.broadcast %cst_8 : f32 to vector<16x128xf32>
    %18 = vector.broadcast %cst_9 : f32 to vector<16x128xf32>
    %19 = arith.select %3, %17, %18 : vector<16x128xi1>, vector<16x128xf32>
    %20 = math.log %16 : vector<16x128xf32>
    %21 = arith.mulf %19, %20 : vector<16x128xf32>
    %cst_10 = arith.constant -18.420681 : f32
    %22 = vector.broadcast %cst_10 : f32 to vector<16x128xf32>
    %23 = arith.maximumf %21, %22 : vector<16x128xf32>
    %cst_11 = arith.constant 1.000000e+00 : f32
    %24 = vector.broadcast %cst_11 : f32 to vector<16x128xf32>
    %25 = arith.subf %24, %15 : vector<16x128xf32>
    %26 = arith.mulf %25, %25 : vector<16x128xf32>
    %27 = arith.mulf %26, %26 : vector<16x128xf32>
    %28 = arith.select %3, %11, %27 : vector<16x128xi1>, vector<16x128xf32>
    %29 = arith.mulf %23, %28 : vector<16x128xf32>
    %cst_12 = arith.constant dense<0.000000e+00> : vector<128xf32>
    %30 = vector.multi_reduction <add>, %29, %cst_12 [0] : vector<16x128xf32> to vector<128xf32>
    %31 = vector.shape_cast %30 : vector<128xf32> to vector<1x128xf32>
    %32 = vector.shape_cast %31 : vector<1x128xf32> to vector<1x1x128xf32>
    %c0_13 = arith.constant 0 : index
    %c0_14 = arith.constant 0 : index
    %c0_15 = arith.constant 0 : index
    %33 = vector.load %arg4[%c0_13, %c0_14, %c0_15] : memref<1x1x128xf32, #tpu.memory_space<vmem>>, vector<1x1x128xf32>
    tpu.vector_store %arg4[%c0_13, %c0_14, %c0_15], %32 {strides = array<i32>} : memref<1x1x128xf32, #tpu.memory_space<vmem>>, vector<1x1x128xf32>,
    return
  }
  func.func @transform_0(%arg0: i32, %arg1: i32) -> (i32, i32) {
    %c0_i32 = arith.constant 0 : i32
    return %arg0, %arg1 : i32, i32
  }
  func.func @transform_1(%arg0: i32, %arg1: i32) -> (i32, i32) {
    %c0_i32 = arith.constant 0 : i32
    return %arg0, %arg1 : i32, i32
  }
  func.func @transform_2(%arg0: i32, %arg1: i32) -> (i32, i32, i32) {
    %c0_i32 = arith.constant 0 : i32
    %c0_i32_0 = arith.constant 0 : i32
    return %arg0, %c0_i32, %arg1 : i32, i32, i32
  }
}

</mosaic_0001>

<bundles_post_ra>
// kernel: tpu_custom_call.1
= control target key start
LH: loop header
LB: loop body
LE: loop exit
PB: predicated region body
PF: predicated region fallthrough
CT: control target
= control target key end

     0   :  { %7 = vsyncpa [#allocation3], 0  ;;  %s901_s0 = inlined_call_operand.hbm [shape: f32[16,256], index: 0, kind: input, shape index: {}]   ;;  %s902_s1 = inlined_call_operand.hbm [shape: f32[16,256], index: 1, kind: input, shape index: {}]   ;;  %s903_s2 = inlined_call_operand.hbm [shape: f32[1,1,256], index: 2, kind: output, shape index: {}]  }
   0x1   :  { %9 = vsyncpa [#allocation3 + $0x1], 0 }
   0x2   :  { %10 = vsyncpa [#allocation6], 0 }
   0x3   :  { %12 = vsyncpa [#allocation6 + $0x1], 0 }
   0x4   :  { %13 = vsyncpa [#allocation4], 0 }
   0x5   :  { %15 = vsyncpa [#allocation4 + $0x1], 0  ;;  %s662_s9 = smov 0   ;;  %s664_s10 = smov 0  }
   0x6   :  { %s666_s11 = smov 0   ;;  %s668_s12 = smov 0  }
   0x7   :  { %s670_s13 = smov 0   ;;  %s672_s14 = smov 0  }
   0x8 LB: > { %s395_s15 = sadd.s32 4294967295, %s638_s14   ;;  %s396_s16 = sadd.s32 4294967294, %s638_s14   ;;  %s638_s14 = sphi %s672_s14, %s21_s14   ;;  %s634_s13 = sphi %s670_s13, %s920_s13   ;;  %s630_s12 = sphi %s668_s12, %s919_s12   ;;  %s626_s11 = sphi %s666_s11, %s918_s11   ;;  %s622_s10 = sphi %s664_s10, %s917_s10   ;;  %s618_s9 = sphi %s662_s9, %s916_s9  }
   0x9   : > { %s30_s17 = sadd.s32 1, %s634_s13  ;;  %s42_s18 = sadd.s32 1, %s626_s11 }
   0xa   : > { %p31_p0 = scmp.ge.s32.totalorder %s30_s17, 2  ;;  %p49_p1 = scmp.ne.s32.totalorder %s626_s11, %s622_s10 }
   0xb   : > { %p50_p2 = scmp.eq.s32.totalorder %s638_s14, 0  ;;  %p55_p3 = scmp.ne.s32.totalorder %s622_s10, %s618_s9 }
   0xc   : > { %s922_s17 = smov (%p31_p0, %s30_s17), 0  ;;  %p56_p5 = scmp.eq.s32.totalorder %s395_s15, 0 }
   0xd   : > { %p703_p4 = por %p50_p2, %p49_p1  ;;  %s38_s20 = ssub.s32 %s634_s13, %s922_s17 }
   0xe   : > { %p109_p6 = scmp.eq.s32.totalorder %s395_s15, 1  ;;  %p40_p7 = scmp.eq.s32.totalorder %s38_s20, 0 }
   0xf   : > { %p709_p8 = por %p56_p5, %p55_p3  ;;  %p115_p10 = scmp.eq.s32.totalorder %s396_s16, 1 }
  0x10   : > { %p713_p9 = por %p109_p6, %p49_p1  ;;  %p426_p13 = scmp.lt.s32.totalorder %s638_s14, 2 }
  0x11   : > { %s907_s21 = scalar_select %p709_p8, 1, 0 }
  0x12   : > { %s908_s22 = scalar_select %p713_p9, 1, 0 }
  0x13   : > { %s718_s23 = scalar_select %p40_p7, %s626_s11, %s42_s18  }
  0x14   : > { %p720_p11 = por %p115_p10, %p55_p3  ;;  %s727_s25 = sand.u32 1, %s626_s11  }
  0x15   : > { %s399_s26 = sshll.u32 %s727_s25, 4  ;;  %s400_s27 = sshll.u32 %s634_s13, 7 }
  0x16   : > { %s909_s24 = scalar_select %p720_p11, 1, 0 }
  0x17   : > { %s736_s30 = scalar_lea.hbm %s901_s0, %s400_s27  ;;  %s139_s3 = scalar_lea.vmem [#allocation2], %s399_s26 }
  0x18   : > { %s148_s4 = sshll.u32 %s139_s3, 4  ;;  %p744_p0 = pnand %p426_p13, %p703_p4  ;;  %s740_s4 = int_to_ptr.vmem [resolvable:$true] %s148_s4 }
  0x19   : > { %s136_s6 = scalar_lea.sflag [#allocation3], %s727_s25  ;;  %s492_s7 = scalar_lea.hbm %s736_s30, 256 }
  0x1a   : > { %p493_p1 = scmp.ne.s32.totalorder %s736_s30, %s492_s7  ;;  %p494_p2 = pneg %p744_p0 }
  0x1b   : > { %s497_s16 = scalar_lea.hbm %s901_s0, 512  ;;  %p498_p4 = scmp.lt.u32.totalorder %s736_s30, %s901_s0 }
  0x1c   : > { %p495_p3 = pnand %p494_p2, %p493_p1  ;;  %p499_p6 = scmp.lt.u32.totalorder %s497_s16, %s492_s7 }
  0x1d   : > { %p501_p10 = scmp.lt.u32.totalorder %s492_s7, %s736_s30 }
  0x1e   : > { %p496_p5 = pneg %p495_p3  ;;  %p500_p7 = por %p499_p6, %p498_p4 }
  0x20   : > { %p502_p13 = por %p501_p10, %p500_p7 }
  0x22   : > { %p503_p12 = pnand %p502_p13, %p496_p5 }
  0x24   : > { %506 = shalt.err (!%p503_p12)
}
  0x25   : > { %s507_s20 = scalar_lea.vmem %s740_s4, 256  ;;  %s640_s28 = smov [#allocation2]  }
  0x26   : > { %p508_p1 = scmp.ne.s32.totalorder %s740_s4, %s507_s20  ;;  %s512_s29 = sshll.u32 %s640_s28, 4  ;;  %s513_s29 = int_to_ptr.vmem [resolvable:$false] %s512_s29 }
  0x27   : > { %s514_s3 = scalar_lea.vmem %s513_s29, 512  ;;  %p515_p9 = scmp.lt.s32.totalorder %s740_s4, %s513_s29 }
  0x28   : > { %p510_p3 = pnand %p508_p1, %p494_p2  ;;  %p516_p4 = scmp.lt.s32.totalorder %s514_s3, %s507_s20 }
  0x2a   : > { %p511_p11 = pneg %p510_p3  ;;  %p517_p6 = por %p516_p4, %p515_p9 }
  0x2c   : > { %p518_p7 = pnand %p517_p6, %p511_p11 }
  0x2e   : > { %521 = shalt.err (!%p518_p7)
}
  0x2f   : > { %s641_s7 = smov 256   ;;  %s642_s8 = smov 128  }
  0x30   : > { %s643_s15 = smov 8   ;;  %p403_p9 = scmp.ge.s32.totalorder %s638_s14, 1 }
  0x31   : > { %418 = dma.hbm_to_vmem [thread:$0]  (!%p744_p0), %s736_s30, 256, %s740_s4, %s136_s6, %s641_s7, %s642_s8, %s643_s15  }
  0x32   : > { %p179_p11 = scmp.lt.s32.totalorder %s638_s14, 3  ;;  %s790_s20 = scalar_lea.hbm %s902_s1, %s400_s27 }
  0x33   : > { %s162_s28 = scalar_lea.vmem [#allocation5], %s399_s26  ;;  %s159_s30 = scalar_lea.sflag [#allocation6], %s727_s25 }
  0x34   : > { %p781_p12 = pnand %p403_p9, %p179_p11  ;;  %s171_s29 = sshll.u32 %s162_s28, 4  ;;  %s794_s29 = int_to_ptr.vmem [resolvable:$true] %s171_s29 }
  0x35   : > { %s522_s4 = scalar_lea.hbm %s790_s20, 256  ;;  %s527_s27 = scalar_lea.hbm %s902_s1, 512 }
  0x36   : > { %p523_p5 = scmp.ne.s32.totalorder %s790_s20, %s522_s4  ;;  %p528_p1 = scmp.lt.u32.totalorder %s790_s20, %s902_s1 }
  0x37   : > { %p529_p3 = scmp.lt.u32.totalorder %s527_s27, %s522_s4  ;;  %p531_p6 = scmp.lt.u32.totalorder %s522_s4, %s790_s20 }
  0x38   : > { %p525_p10 = pnand %p523_p5, %p494_p2 }
  0x39   : > { %p530_p4 = por %p529_p3, %p528_p1 }
  0x3a   : > { %p526_p13 = pneg %p525_p10 }
  0x3b   : > { %p532_p7 = por %p531_p6, %p530_p4 }
  0x3d   : > { %p533_p9 = pnand %p532_p7, %p526_p13 }
  0x3f   : > { %536 = shalt.err (!%p533_p9)
}
  0x40   : > { %s537_s26 = scalar_lea.vmem %s794_s29, 256  ;;  %s644_s28 = smov [#allocation5]  }
  0x41   : > { %p538_p11 = scmp.ne.s32.totalorder %s794_s29, %s537_s26  ;;  %s542_s6 = sshll.u32 %s644_s28, 4  ;;  %s543_s6 = int_to_ptr.vmem [resolvable:$false] %s542_s6 }
  0x42   : > { %s544_s3 = scalar_lea.vmem %s543_s6, 512  ;;  %p545_p8 = scmp.lt.s32.totalorder %s794_s29, %s543_s6 }
  0x43   : > { %p540_p5 = pnand %p538_p11, %p494_p2  ;;  %p546_p1 = scmp.lt.s32.totalorder %s544_s3, %s537_s26 }
  0x45   : > { %p541_p10 = pneg %p540_p5  ;;  %p547_p3 = por %p546_p1, %p545_p8 }
  0x47   : > { %p548_p4 = pnand %p547_p3, %p541_p10 }
  0x49   : > { %551 = shalt.err (!%p548_p4)
}
  0x4a   : > { %421 = dma.hbm_to_vmem [thread:$0]  (!%p744_p0), %s790_s20, 256, %s794_s29, %s159_s30, %s641_s7, %s642_s8, %s643_s15  }
  0x4b   : > { %183 = sbr.rel (%p781_p12) target bundleno = 169 (0xa9), region = 28  ;;  %s828_s4 = sand.u32 (!%p781_p12), 1, %s622_s10  }
  0x4c   : > { %s404_s27 = sshll.u32 (!%p781_p12), %s828_s4, 4  ;;  %s186_s18 = scalar_lea.sflag (!%p781_p12), [#allocation3], %s828_s4 }
  0x4d   : > { %s189_s5 = scalar_lea.vmem (!%p781_p12), [#allocation2], %s404_s27  ;;  %p912_p8 = scmp.ne.s32.totalorder (!%p781_p12), %s907_s21, 0 }
  0x52   : > { %605 = dma.done.wait (%p912_p8), %s186_s18, 256  }
  0x53   : > { %607 = vsyncadd (%p912_p8), %s186_s18, 4294967040  ;;  %s195_s25 = scalar_lea.sflag [#allocation6], %s828_s4  ;;  %s198_s7 = scalar_lea.vmem [#allocation5], %s404_s27 }
  0x54   : > { %609 = dma.done.wait (%p912_p8), %s195_s25, 256  }
  0x55   : > { %611 = vsyncadd (%p912_p8), %s195_s25, 4294967040  ;;  %v225_v0 = vld [vmem:[%s189_s5] sm:$0xff]  ;;  %v226_v1 = vld [vmem:[%s189_s5 + $0x8] sm:$0xff]  ;;  %v645_v27 = vmov 1.0   ;;  %s222_s21 = scalar_lea.vmem [#allocation7], %s828_s4  ;;  %s406_s15 = sshll.u32 %s630_s12, 4 }
  0x56   : > { %v231_v2 = vsub.f32 0.0, %v225_v0  ;;  %v232_v3 = vsub.f32 0.0, %v226_v1  ;;  %v227_v12 = vld [vmem:[%s198_s7] sm:$0xff]  ;;  %v228_v14 = vld [vmem:[%s198_s7 + $0x8] sm:$0xff]  ;;  %s292_s8 = sshll.u32 %s222_s21, 4  ;;  %s854_s29 = scalar_lea.hbm %s903_s2, %s406_s15  ;;  %s849_s8 = int_to_ptr.vmem [resolvable:$true] %s292_s8 }
  0x57   : > { %vm229_vm0 = vcmp.gt.f32.partialorder %v227_v12, 0.5  ;;  %vm230_vm1 = vcmp.gt.f32.partialorder %v228_v14, 0.5  ;;  %s278_s30 = scalar_lea.sflag [#allocation4], %s828_s4  ;;  %s552_s19 = scalar_lea.vmem %s849_s8, 16 }
  0x58   : > { %v233_v4 = vmul.f32 1.442695, %v231_v2  ;;  %v235_v5 = vmul.f32 1.442695, %v232_v3  ;;  %v249_v28 = vsel %vm229_vm0, -1.0, %v645_v27  ;;  %v250_v31 = vsel %vm230_vm1, -1.0, %v645_v27  ;;  %p553_p0 = scmp.ne.s32.totalorder %s849_s8, %s552_s19 }
  0x59   : > { %p913_p2 = scmp.ne.s32.totalorder %s908_s22, 0  ;;  %s646_s12 = smov [#allocation7]  }
  0x5a   : > { %480 = vpow2.f32 %v233_v4  ;;  %s556_s26 = sshll.u32 %s646_s12, 4  ;;  %s557_s26 = int_to_ptr.vmem [resolvable:$false] %s556_s26 }
  0x5b   : > { %482 = vpow2.f32 %v235_v5  ;;  %p554_p12 = pnand %p553_p0, %p913_p2  ;;  %s558_s28 = scalar_lea.vmem %s557_s26, 32 }
  0x5c   : > { %p559_p6 = scmp.lt.s32.totalorder %s849_s8, %s557_s26  ;;  %p560_p7 = scmp.lt.s32.totalorder %s558_s28, %s552_s19 }
  0x5d   : > { %p555_p13 = pneg %p554_p12 }
  0x5e   : > { %p561_p9 = por %p560_p7, %p559_p6 }
  0x60   : > { %p562_p11 = pnand %p561_p9, %p555_p13 }
  0x64   : > { %v481_v6 = vpop.eup %480 }
  0x65   : > { %v483_v7 = vpop.eup %482  ;;  %v237_v8 = vadd.f32 1.0, %v481_v6 }
  0x66   : > { %v238_v9 = vadd.f32 1.0, %v483_v7 }
  0x67   : > { %484 = vrcp.f32 %v237_v8 }
  0x68   : > { %486 = vrcp.f32 %v238_v9 }
  0x71   : > { %v485_v10 = vpop.eup %484 }
  0x72   : > { %v487_v11 = vpop.eup %486  ;;  %v241_v13 = vsub.f32 1.0, %v485_v10 }
  0x73   : > { %v242_v15 = vsub.f32 1.0, %v487_v11 }
  0x74   : > { %v243_v16 = vadd.f32 0.05, %v241_v13 }
  0x75   : > { %v244_v17 = vadd.f32 0.05, %v242_v15 }
  0x76   : > { %v245_v18 = vmin.f32 %v243_v16, 1.0 }
  0x77   : > { %v246_v19 = vmin.f32 %v244_v17, 1.0 }
  0x78   : > { %v247_v20 = vsel %vm229_vm0, %v237_v8, %v245_v18  ;;  %v259_v22 = vsub.f32 1.0, %v245_v18 }
  0x79   : > { %v248_v21 = vsel %vm230_vm1, %v238_v9, %v246_v19  ;;  %488 = vlog2.f32 %v247_v20  ;;  %v260_v23 = vsub.f32 1.0, %v246_v19 }
  0x7a   : > { %490 = vlog2.f32 %v248_v21  ;;  %v261_v24 = vmul.f32 %v259_v22, %v259_v22 }
  0x7b   : > { %v262_v25 = vmul.f32 %v260_v23, %v260_v23 }
  0x7c   : > { %v263_v29 = vmul.f32 %v261_v24, %v261_v24 }
  0x7d   : > { %v264_v33 = vmul.f32 %v262_v25, %v262_v25 }
  0x7e   : > { %v265_v37 = vsel %vm229_vm0, %v241_v13, %v263_v29 }
  0x7f   : > { %v266_v39 = vsel %vm230_vm1, %v242_v15, %v264_v33 }
  0x83   : > { %v489_v26 = vpop.eup %488 }
  0x84   : > { %v491_v30 = vpop.eup %490  ;;  %v252_v32 = vmul.f32 0.6931472, %v489_v26 }
  0x85   : > { %v254_v34 = vmul.f32 0.6931472, %v491_v30 }
  0x86   : > { %v255_v35 = vmul.f32 %v252_v32, %v249_v28 }
  0x87   : > { %v256_v36 = vmul.f32 %v254_v34, %v250_v31 }
  0x88   : > { %v257_v38 = vmax.f32 %v255_v35, -18.420681 }
  0x89   : > { %v258_v40 = vmax.f32 %v256_v36, -18.420681 }
  0x8a   : > { %v267_v41 = vmul.f32 %v265_v37, %v257_v38 }
  0x8b   : > { %v268_v42 = vmul.f32 %v266_v39, %v258_v40 }
  0x8d   : > { %v269_v43 = vadd.f32 %v268_v42, %v267_v41 }
  0x8f   : > { %v270_v44 = vrot.slane %v269_v43, 4 }
  0x91   : > { %v271_v45 = vadd.f32 %v270_v44, %v269_v43 }
  0x93   : > { %v272_v46 = vrot.slane %v271_v45, 2 }
  0x95   : > { %v273_v47 = vadd.f32 %v272_v46, %v271_v45 }
  0x97   : > { %v274_v48 = vrot.slane %v273_v47, 1 }
  0x99   : > { %v275_v49 = vadd.f32 %v274_v48, %v273_v47 }
  0x9b   : > { %276 = vst [vmem:[%s222_s21] sm:$0x1] %v275_v49 }
  0x9c   : > { %565 = shalt.err (!%p562_p11)
}
  0x9d   : > { %s566_s6 = scalar_lea.hbm %s854_s29, 16  ;;  %s570_s27 = scalar_lea.hbm %s903_s2, 32 }
  0x9e   : > { %p567_p5 = scmp.ne.s32.totalorder %s854_s29, %s566_s6  ;;  %p571_p3 = scmp.lt.u32.totalorder %s854_s29, %s903_s2 }
  0x9f   : > { %p572_p4 = scmp.lt.u32.totalorder %s570_s27, %s566_s6  ;;  %p574_p0 = scmp.lt.u32.totalorder %s566_s6, %s854_s29 }
  0xa0   : > { %p568_p10 = pnand %p567_p5, %p913_p2 }
  0xa1   : > { %p573_p8 = por %p572_p4, %p571_p3 }
  0xa2   : > { %p569_p1 = pneg %p568_p10 }
  0xa3   : > { %p575_p12 = por %p574_p0, %p573_p8 }
  0xa5   : > { %p576_p13 = pnand %p575_p12, %p569_p1 }
  0xa7   : > { %579 = shalt.err (!%p576_p13)
}
  0xa8   : > { %413 = dma.vmem_to_hbm [thread:$0]  (%p913_p2), %s849_s8, 16, %s854_s29, %s278_s30  }
  0xa9 PF: > { %s304_s25 = sand.u32 1, %s618_s9   ;;  %p914_p6 = scmp.ne.s32.totalorder %s909_s24, 0 }
  0xaa   : > { %p915_p7 = scmp.ge.s32.totalorder %s638_s14, 2  ;;  %s305_s7 = scalar_lea.sflag [#allocation4], %s304_s25 }
  0xac   : > { %p423_p9 = pnand %p915_p7, %p914_p6 }
  0xae   : > { %613 = dma.done.wait (!%p423_p9), %s305_s7, 16  }
  0xaf   : > { %615 = vsyncadd (!%p423_p9), %s305_s7, 4294967280  ;;  %s21_s14 = sadd.s32 1, %s638_s14   ;;  %s916_s9 = smov %s622_s10 }
  0xb0   : > { %p18_p11 = scmp.ge.s32.totalorder %s21_s14, 4   ;;  %s917_s10 = smov %s626_s11 }
  0xb1   : > { %s918_s11 = smov %s718_s23  ;;  %s919_s12 = smov %s634_s13 }
  0xb2   : > { %s920_s13 = smov %s922_s17  ;;  %20 = sbr.rel (!%p18_p11) target bundleno = 8 (0x8), region = 86 }
  0xb9   :  { %309 = vsyncpa [#allocation3], 1 }
  0xba   :  { %311 = vsyncpa [#allocation3 + $0x1], 1 }
  0xbb   :  { %312 = vsyncpa [#allocation6], 1 }
  0xbc   :  { %314 = vsyncpa [#allocation6 + $0x1], 1 }
  0xbd   :  { %315 = vsyncpa [#allocation4], 1 }
  0xbe   :  { %317 = vsyncpa [#allocation4 + $0x1], 1 }

</bundles_post_ra>
